<compile_context>
chip_gen: v7x
topology: tpu7x:2x2x1
jax: 0.10.0
libtpu: 0.0.40
codegen_flags: <defaults>
</compile_context>

<pallas_src>
import jax
import jax.numpy as jnp
from jax.experimental import pallas as pl
from jax.experimental.pallas import tpu as pltpu

_EPS = 1e-5  # PyTorch BatchNorm1d default eps


def _adv_loss_kernel(s_ref, t_ref, w_ref, pp_ref, out_ref):
    # Packed (8, H) parameter tile: b1, g1, be1, b2, g2, be2, w3, [b3 | 0...].
    pp = pp_ref[...]
    b1, g1, be1 = pp[0:1, :], pp[1:2, :], pp[2:3, :]
    b2, g2, be2 = pp[3:4, :], pp[4:5, :], pp[5:6, :]
    w3 = pp[6:7, :]
    b3 = pp[7:8, 0:1]                       # (1,1) -> broadcasts over (B,1) logits

    def bn_relu(z, g, be):
        # Training-mode BatchNorm1d on this domain's batch, one-pass variance,
        # affine folded into a single scale/shift.
        m = jnp.mean(z, axis=0, keepdims=True)                    # (1,H)
        msq = jnp.mean(z * z, axis=0, keepdims=True)              # (1,H)
        inv = jax.lax.rsqrt(msq - m * m + _EPS)                   # (1,H)
        scale = g * inv                                           # (1,H)
        shift = be - m * scale                                    # (1,H)
        return jnp.maximum(z * scale + shift, 0.0)

    def disc_logits(x):
        # Linear 1 (bf16 MXU, f32 accumulate) + BN + ReLU
        z1 = jnp.dot(x.astype(jnp.bfloat16), w_ref[0],
                     preferred_element_type=jnp.float32) + b1
        h1 = bn_relu(z1, g1, be1)
        # Linear 2 + BN + ReLU
        z2 = jnp.dot(h1.astype(jnp.bfloat16), w_ref[1],
                     preferred_element_type=jnp.float32) + b2
        h2 = bn_relu(z2, g2, be2)
        # Linear 3 (H -> 1) as an f32 lane reduction; logit path stays f32.
        return jnp.sum(h2 * w3, axis=-1, keepdims=True) + b3      # (B,1)

    def bce_mean(logits, is_source):
        # Stable softplus form of BCE-with-sigmoid:
        #   source: -log(sigmoid(x))   = softplus(-x) = softplus(x) - x
        #   target: -log(1-sigmoid(x)) = softplus(x)
        sp = jnp.maximum(logits, 0.0) + jnp.log1p(jnp.exp(-jnp.abs(logits)))
        term = sp - logits if is_source else sp
        return jnp.mean(jnp.minimum(term, 100.0))

    src_loss = bce_mean(disc_logits(s_ref[...]), True)
    tgt_loss = bce_mean(disc_logits(t_ref[...]), False)
    out_ref[0, 0] = 0.5 * (src_loss + tgt_loss)


def adversarial_loss(source, target, packed_params):
    """packed_params = (w_stack[2,H,H] bf16, pp[8,H] f32 with b3 in pp[7,0])."""
    w_stack, pp = packed_params
    Bs, D = source.shape
    Bt, _ = target.shape
    H = w_stack.shape[-1]

    flops = 2 * (Bs + Bt) * D * H + 2 * (Bs + Bt) * H * H          # two MXU layers
    bytes_accessed = (source.size * source.dtype.itemsize
                      + target.size * target.dtype.itemsize
                      + w_stack.size * w_stack.dtype.itemsize
                      + pp.size * pp.dtype.itemsize
                      + 4)
    transcendentals = (Bs + Bt) + 4 * H                            # exp + rsqrt

    vmem = pl.BlockSpec(memory_space=pltpu.MemorySpace.VMEM)
    smem = pl.BlockSpec(memory_space=pltpu.MemorySpace.SMEM)

    out = pl.pallas_call(
        _adv_loss_kernel,
        out_shape=jax.ShapeDtypeStruct((1, 1), jnp.float32),
        in_specs=[vmem, vmem, vmem, vmem],
        out_specs=smem,
        cost_estimate=pl.CostEstimate(
            flops=flops,
            transcendentals=transcendentals,
            bytes_accessed=bytes_accessed),
    )(source, target, w_stack, pp)
    return out[0, 0]


def init_params(key, input_dim=256, hidden_dim=256):
    """PyTorch-default init (Linear: U(-1/sqrt(fan_in), .); BN: gamma=1, beta=0),
    packed into the kernel's layout.  Requires input_dim == hidden_dim (module default)."""
    assert input_dim == hidden_dim, \
        "weight stacking assumes square first layer (module default 256x256)"
    ks = jax.random.split(key, 3)

    def linear_init(k, fan_in, fan_out):
        bound = 1.0 / jnp.sqrt(jnp.float32(fan_in))
        kw, kb = jax.random.split(k)
        w = jax.random.uniform(kw, (fan_in, fan_out), jnp.float32, -bound, bound)
        b = jax.random.uniform(kb, (1, fan_out), jnp.float32, -bound, bound)
        return w, b

    w1, b1 = linear_init(ks[0], input_dim, hidden_dim)      # (D,H), (1,H)
    w2, b2 = linear_init(ks[1], hidden_dim, hidden_dim)     # (H,H), (1,H)
    w3_full, b3_full = linear_init(ks[2], hidden_dim, 1)    # (H,1), (1,1)

    g1 = jnp.ones((1, hidden_dim), jnp.float32)
    be1 = jnp.zeros((1, hidden_dim), jnp.float32)
    g2 = jnp.ones((1, hidden_dim), jnp.float32)
    be2 = jnp.zeros((1, hidden_dim), jnp.float32)

    # Two big weights as one bf16 (2,H,H) input; eight small rows as one (8,H) f32 tile,
    # with the final-layer bias b3 folded into the otherwise-unused pad row at [7,0].
    w_stack = jnp.stack([w1, w2], axis=0).astype(jnp.bfloat16)
    pad = jnp.zeros((1, hidden_dim), jnp.float32).at[0, 0].set(b3_full[0, 0])
    pp = jnp.concatenate([b1, g1, be1, b2, g2, be2, w3_full.T, pad], axis=0)  # (8,H)

    return (w_stack, pp)


if __name__ == "__main__":
    key = jax.random.PRNGKey(0)
    k_src, k_tgt, k_par = jax.random.split(key, 3)

    B, D, H = 8, 256, 256   # Discriminator defaults: input_dim=256, hidden_dim=256
    source = jax.random.normal(k_src, (B, D), jnp.float32)
    target = jax.random.normal(k_tgt, (B, D), jnp.float32) + 0.5

    params = init_params(k_par, D, H)

    loss = adversarial_loss(source, target, params)
    jax.block_until_ready(loss)
    print("KERNEL_OK")
</pallas_src>

<mosaic_0001>
module attributes {stable_mosaic.version = 11 : i64} {
  func.func @_adv_loss_kernel(%arg0: memref<8x256xf32, #tpu.memory_space<vmem>>, %arg1: memref<8x256xf32, #tpu.memory_space<vmem>>, %arg2: memref<2x256x256xbf16, #tpu.memory_space<vmem>>, %arg3: memref<8x256xf32, #tpu.memory_space<vmem>>, %arg4: memref<1x1xf32, #tpu.memory_space<smem>>) attributes {dimension_semantics = [], scalar_prefetch = 0 : i64, scratch_operands = 0 : i64, tpu.core_type = #tpu.core_type<tc>} {
    %c0 = arith.constant 0 : index
    %c0_0 = arith.constant 0 : index
    %0 = vector.load %arg3[%c0, %c0_0] : memref<8x256xf32, #tpu.memory_space<vmem>>, vector<8x256xf32>
    %1 = vector.extract_strided_slice %0 {offsets = [0, 0], sizes = [1, 256], strides = [1, 1]} : vector<8x256xf32> to vector<1x256xf32>
    %2 = vector.extract_strided_slice %0 {offsets = [1, 0], sizes = [1, 256], strides = [1, 1]} : vector<8x256xf32> to vector<1x256xf32>
    %3 = vector.extract_strided_slice %0 {offsets = [2, 0], sizes = [1, 256], strides = [1, 1]} : vector<8x256xf32> to vector<1x256xf32>
    %4 = vector.extract_strided_slice %0 {offsets = [3, 0], sizes = [1, 256], strides = [1, 1]} : vector<8x256xf32> to vector<1x256xf32>
    %5 = vector.extract_strided_slice %0 {offsets = [4, 0], sizes = [1, 256], strides = [1, 1]} : vector<8x256xf32> to vector<1x256xf32>
    %6 = vector.extract_strided_slice %0 {offsets = [5, 0], sizes = [1, 256], strides = [1, 1]} : vector<8x256xf32> to vector<1x256xf32>
    %7 = vector.extract_strided_slice %0 {offsets = [6, 0], sizes = [1, 256], strides = [1, 1]} : vector<8x256xf32> to vector<1x256xf32>
    %8 = vector.extract_strided_slice %0 {offsets = [7, 0], sizes = [1, 1], strides = [1, 1]} : vector<8x256xf32> to vector<1x1xf32>
    %c0_1 = arith.constant 0 : index
    %c0_2 = arith.constant 0 : index
    %9 = vector.load %arg0[%c0_1, %c0_2] : memref<8x256xf32, #tpu.memory_space<vmem>>, vector<8x256xf32>
    %10 = arith.truncf %9 : vector<8x256xf32> to vector<8x256xbf16>
    %c0_3 = arith.constant 0 : index
    %c0_4 = arith.constant 0 : index
    %c0_5 = arith.constant 0 : index
    %11 = vector.load %arg2[%c0_3, %c0_4, %c0_5] : memref<2x256x256xbf16, #tpu.memory_space<vmem>>, vector<1x256x256xbf16>
    %12 = vector.shape_cast %11 : vector<1x256x256xbf16> to vector<256x256xbf16>
    %cst = arith.constant dense<0.000000e+00> : vector<8x256xf32>
    %13 = tpu.matmul %10, %12, %cst {dimension_numbers = #tpu.dot_dimension_numbers<[1], [0], [0], [1], [0, 0, 1, 1], [], []>} : vector<8x256xbf16>, vector<256x256xbf16>, vector<8x256xf32> -> vector<8x256xf32>
    %14 = vector.broadcast %1 : vector<1x256xf32> to vector<8x256xf32>
    %15 = arith.addf %13, %14 : vector<8x256xf32>
    %cst_6 = arith.constant dense<0.000000e+00> : vector<256xf32>
    %16 = vector.multi_reduction <add>, %15, %cst_6 [0] : vector<8x256xf32> to vector<256xf32>
    %17 = vector.shape_cast %16 : vector<256xf32> to vector<1x256xf32>
    %cst_7 = arith.constant 8.000000e+00 : f32
    %18 = vector.broadcast %cst_7 : f32 to vector<1x256xf32>
    %19 = arith.divf %17, %18 : vector<1x256xf32>
    %20 = arith.mulf %15, %15 : vector<8x256xf32>
    %cst_8 = arith.constant dense<0.000000e+00> : vector<256xf32>
    %21 = vector.multi_reduction <add>, %20, %cst_8 [0] : vector<8x256xf32> to vector<256xf32>
    %22 = vector.shape_cast %21 : vector<256xf32> to vector<1x256xf32>
    %cst_9 = arith.constant 8.000000e+00 : f32
    %23 = vector.broadcast %cst_9 : f32 to vector<1x256xf32>
    %24 = arith.divf %22, %23 : vector<1x256xf32>
    %25 = arith.mulf %19, %19 : vector<1x256xf32>
    %26 = arith.subf %24, %25 : vector<1x256xf32>
    %cst_10 = arith.constant 9.99999974E-6 : f32
    %27 = vector.broadcast %cst_10 : f32 to vector<1x256xf32>
    %28 = arith.addf %26, %27 : vector<1x256xf32>
    %29 = math.rsqrt %28 : vector<1x256xf32>
    %30 = arith.mulf %2, %29 : vector<1x256xf32>
    %31 = arith.mulf %19, %30 : vector<1x256xf32>
    %32 = arith.subf %3, %31 : vector<1x256xf32>
    %33 = vector.broadcast %30 : vector<1x256xf32> to vector<8x256xf32>
    %34 = arith.mulf %15, %33 : vector<8x256xf32>
    %35 = vector.broadcast %32 : vector<1x256xf32> to vector<8x256xf32>
    %36 = arith.addf %34, %35 : vector<8x256xf32>
    %cst_11 = arith.constant 0.000000e+00 : f32
    %37 = vector.broadcast %cst_11 : f32 to vector<8x256xf32>
    %38 = arith.maximumf %36, %37 : vector<8x256xf32>
    %39 = arith.truncf %38 : vector<8x256xf32> to vector<8x256xbf16>
    %c1 = arith.constant 1 : index
    %c0_12 = arith.constant 0 : index
    %c0_13 = arith.constant 0 : index
    %40 = vector.load %arg2[%c1, %c0_12, %c0_13] : memref<2x256x256xbf16, #tpu.memory_space<vmem>>, vector<1x256x256xbf16>
    %41 = vector.shape_cast %40 : vector<1x256x256xbf16> to vector<256x256xbf16>
    %cst_14 = arith.constant dense<0.000000e+00> : vector<8x256xf32>
    %42 = tpu.matmul %39, %41, %cst_14 {dimension_numbers = #tpu.dot_dimension_numbers<[1], [0], [0], [1], [0, 0, 1, 1], [], []>} : vector<8x256xbf16>, vector<256x256xbf16>, vector<8x256xf32> -> vector<8x256xf32>
    %43 = vector.broadcast %4 : vector<1x256xf32> to vector<8x256xf32>
    %44 = arith.addf %42, %43 : vector<8x256xf32>
    %cst_15 = arith.constant dense<0.000000e+00> : vector<256xf32>
    %45 = vector.multi_reduction <add>, %44, %cst_15 [0] : vector<8x256xf32> to vector<256xf32>
    %46 = vector.shape_cast %45 : vector<256xf32> to vector<1x256xf32>
    %cst_16 = arith.constant 8.000000e+00 : f32
    %47 = vector.broadcast %cst_16 : f32 to vector<1x256xf32>
    %48 = arith.divf %46, %47 : vector<1x256xf32>
    %49 = arith.mulf %44, %44 : vector<8x256xf32>
    %cst_17 = arith.constant dense<0.000000e+00> : vector<256xf32>
    %50 = vector.multi_reduction <add>, %49, %cst_17 [0] : vector<8x256xf32> to vector<256xf32>
    %51 = vector.shape_cast %50 : vector<256xf32> to vector<1x256xf32>
    %cst_18 = arith.constant 8.000000e+00 : f32
    %52 = vector.broadcast %cst_18 : f32 to vector<1x256xf32>
    %53 = arith.divf %51, %52 : vector<1x256xf32>
    %54 = arith.mulf %48, %48 : vector<1x256xf32>
    %55 = arith.subf %53, %54 : vector<1x256xf32>
    %cst_19 = arith.constant 9.99999974E-6 : f32
    %56 = vector.broadcast %cst_19 : f32 to vector<1x256xf32>
    %57 = arith.addf %55, %56 : vector<1x256xf32>
    %58 = math.rsqrt %57 : vector<1x256xf32>
    %59 = arith.mulf %5, %58 : vector<1x256xf32>
    %60 = arith.mulf %48, %59 : vector<1x256xf32>
    %61 = arith.subf %6, %60 : vector<1x256xf32>
    %62 = vector.broadcast %59 : vector<1x256xf32> to vector<8x256xf32>
    %63 = arith.mulf %44, %62 : vector<8x256xf32>
    %64 = vector.broadcast %61 : vector<1x256xf32> to vector<8x256xf32>
    %65 = arith.addf %63, %64 : vector<8x256xf32>
    %cst_20 = arith.constant 0.000000e+00 : f32
    %66 = vector.broadcast %cst_20 : f32 to vector<8x256xf32>
    %67 = arith.maximumf %65, %66 : vector<8x256xf32>
    %68 = vector.broadcast %7 : vector<1x256xf32> to vector<8x256xf32>
    %69 = arith.mulf %67, %68 : vector<8x256xf32>
    %cst_21 = arith.constant dense<0.000000e+00> : vector<8xf32>
    %70 = vector.multi_reduction <add>, %69, %cst_21 [1] : vector<8x256xf32> to vector<8xf32>
    %71 = vector.shape_cast %70 : vector<8xf32> to vector<8x1xf32>
    %72 = vector.broadcast %8 : vector<1x1xf32> to vector<8x1xf32>
    %73 = arith.addf %71, %72 : vector<8x1xf32>
    %cst_22 = arith.constant 0.000000e+00 : f32
    %74 = vector.broadcast %cst_22 : f32 to vector<8x1xf32>
    %75 = arith.maximumf %73, %74 : vector<8x1xf32>
    %76 = math.absf %73 : vector<8x1xf32>
    %cst_23 = arith.constant 0.000000e+00 : f32
    %77 = vector.broadcast %cst_23 : f32 to vector<8x1xf32>
    %78 = arith.subf %77, %76 : vector<8x1xf32>
    %79 = math.exp %78 : vector<8x1xf32>
    %80 = math.log1p %79 : vector<8x1xf32>
    %81 = arith.addf %75, %80 : vector<8x1xf32>
    %82 = arith.subf %81, %73 : vector<8x1xf32>
    %cst_24 = arith.constant 1.000000e+02 : f32
    %83 = vector.broadcast %cst_24 : f32 to vector<8x1xf32>
    %84 = arith.minimumf %82, %83 : vector<8x1xf32>
    %85 = vector.shape_cast %84 : vector<8x1xf32> to vector<1x8x1xf32>
    %cst_25 = arith.constant dense<0.000000e+00> : vector<1xf32>
    %86 = vector.multi_reduction <add>, %85, %cst_25 [1, 2] : vector<1x8x1xf32> to vector<1xf32>
    %87 = vector.shape_cast %86 : vector<1xf32> to vector<1x1x1xf32>
    %88 = vector.extract %87[0, 0, 0] : f32 from vector<1x1x1xf32>
    %cst_26 = arith.constant 8.000000e+00 : f32
    %89 = arith.divf %88, %cst_26 : f32
    %c0_27 = arith.constant 0 : index
    %c0_28 = arith.constant 0 : index
    %90 = vector.load %arg1[%c0_27, %c0_28] : memref<8x256xf32, #tpu.memory_space<vmem>>, vector<8x256xf32>
    %91 = arith.truncf %90 : vector<8x256xf32> to vector<8x256xbf16>
    %c0_29 = arith.constant 0 : index
    %c0_30 = arith.constant 0 : index
    %c0_31 = arith.constant 0 : index
    %92 = vector.load %arg2[%c0_29, %c0_30, %c0_31] : memref<2x256x256xbf16, #tpu.memory_space<vmem>>, vector<1x256x256xbf16>
    %93 = vector.shape_cast %92 : vector<1x256x256xbf16> to vector<256x256xbf16>
    %cst_32 = arith.constant dense<0.000000e+00> : vector<8x256xf32>
    %94 = tpu.matmul %91, %93, %cst_32 {dimension_numbers = #tpu.dot_dimension_numbers<[1], [0], [0], [1], [0, 0, 1, 1], [], []>} : vector<8x256xbf16>, vector<256x256xbf16>, vector<8x256xf32> -> vector<8x256xf32>
    %95 = vector.broadcast %1 : vector<1x256xf32> to vector<8x256xf32>
    %96 = arith.addf %94, %95 : vector<8x256xf32>
    %cst_33 = arith.constant dense<0.000000e+00> : vector<256xf32>
    %97 = vector.multi_reduction <add>, %96, %cst_33 [0] : vector<8x256xf32> to vector<256xf32>
    %98 = vector.shape_cast %97 : vector<256xf32> to vector<1x256xf32>
    %cst_34 = arith.constant 8.000000e+00 : f32
    %99 = vector.broadcast %cst_34 : f32 to vector<1x256xf32>
    %100 = arith.divf %98, %99 : vector<1x256xf32>
    %101 = arith.mulf %96, %96 : vector<8x256xf32>
    %cst_35 = arith.constant dense<0.000000e+00> : vector<256xf32>
    %102 = vector.multi_reduction <add>, %101, %cst_35 [0] : vector<8x256xf32> to vector<256xf32>
    %103 = vector.shape_cast %102 : vector<256xf32> to vector<1x256xf32>
    %cst_36 = arith.constant 8.000000e+00 : f32
    %104 = vector.broadcast %cst_36 : f32 to vector<1x256xf32>
    %105 = arith.divf %103, %104 : vector<1x256xf32>
    %106 = arith.mulf %100, %100 : vector<1x256xf32>
    %107 = arith.subf %105, %106 : vector<1x256xf32>
    %cst_37 = arith.constant 9.99999974E-6 : f32
    %108 = vector.broadcast %cst_37 : f32 to vector<1x256xf32>
    %109 = arith.addf %107, %108 : vector<1x256xf32>
    %110 = math.rsqrt %109 : vector<1x256xf32>
    %111 = arith.mulf %2, %110 : vector<1x256xf32>
    %112 = arith.mulf %100, %111 : vector<1x256xf32>
    %113 = arith.subf %3, %112 : vector<1x256xf32>
    %114 = vector.broadcast %111 : vector<1x256xf32> to vector<8x256xf32>
    %115 = arith.mulf %96, %114 : vector<8x256xf32>
    %116 = vector.broadcast %113 : vector<1x256xf32> to vector<8x256xf32>
    %117 = arith.addf %115, %116 : vector<8x256xf32>
    %cst_38 = arith.constant 0.000000e+00 : f32
    %118 = vector.broadcast %cst_38 : f32 to vector<8x256xf32>
    %119 = arith.maximumf %117, %118 : vector<8x256xf32>
    %120 = arith.truncf %119 : vector<8x256xf32> to vector<8x256xbf16>
    %c1_39 = arith.constant 1 : index
    %c0_40 = arith.constant 0 : index
    %c0_41 = arith.constant 0 : index
    %121 = vector.load %arg2[%c1_39, %c0_40, %c0_41] : memref<2x256x256xbf16, #tpu.memory_space<vmem>>, vector<1x256x256xbf16>
    %122 = vector.shape_cast %121 : vector<1x256x256xbf16> to vector<256x256xbf16>
    %cst_42 = arith.constant dense<0.000000e+00> : vector<8x256xf32>
    %123 = tpu.matmul %120, %122, %cst_42 {dimension_numbers = #tpu.dot_dimension_numbers<[1], [0], [0], [1], [0, 0, 1, 1], [], []>} : vector<8x256xbf16>, vector<256x256xbf16>, vector<8x256xf32> -> vector<8x256xf32>
    %124 = vector.broadcast %4 : vector<1x256xf32> to vector<8x256xf32>
    %125 = arith.addf %123, %124 : vector<8x256xf32>
    %cst_43 = arith.constant dense<0.000000e+00> : vector<256xf32>
    %126 = vector.multi_reduction <add>, %125, %cst_43 [0] : vector<8x256xf32> to vector<256xf32>
    %127 = vector.shape_cast %126 : vector<256xf32> to vector<1x256xf32>
    %cst_44 = arith.constant 8.000000e+00 : f32
    %128 = vector.broadcast %cst_44 : f32 to vector<1x256xf32>
    %129 = arith.divf %127, %128 : vector<1x256xf32>
    %130 = arith.mulf %125, %125 : vector<8x256xf32>
    %cst_45 = arith.constant dense<0.000000e+00> : vector<256xf32>
    %131 = vector.multi_reduction <add>, %130, %cst_45 [0] : vector<8x256xf32> to vector<256xf32>
    %132 = vector.shape_cast %131 : vector<256xf32> to vector<1x256xf32>
    %cst_46 = arith.constant 8.000000e+00 : f32
    %133 = vector.broadcast %cst_46 : f32 to vector<1x256xf32>
    %134 = arith.divf %132, %133 : vector<1x256xf32>
    %135 = arith.mulf %129, %129 : vector<1x256xf32>
    %136 = arith.subf %134, %135 : vector<1x256xf32>
    %cst_47 = arith.constant 9.99999974E-6 : f32
    %137 = vector.broadcast %cst_47 : f32 to vector<1x256xf32>
    %138 = arith.addf %136, %137 : vector<1x256xf32>
    %139 = math.rsqrt %138 : vector<1x256xf32>
    %140 = arith.mulf %5, %139 : vector<1x256xf32>
    %141 = arith.mulf %129, %140 : vector<1x256xf32>
    %142 = arith.subf %6, %141 : vector<1x256xf32>
    %143 = vector.broadcast %140 : vector<1x256xf32> to vector<8x256xf32>
    %144 = arith.mulf %125, %143 : vector<8x256xf32>
    %145 = vector.broadcast %142 : vector<1x256xf32> to vector<8x256xf32>
    %146 = arith.addf %144, %145 : vector<8x256xf32>
    %cst_48 = arith.constant 0.000000e+00 : f32
    %147 = vector.broadcast %cst_48 : f32 to vector<8x256xf32>
    %148 = arith.maximumf %146, %147 : vector<8x256xf32>
    %149 = vector.broadcast %7 : vector<1x256xf32> to vector<8x256xf32>
    %150 = arith.mulf %148, %149 : vector<8x256xf32>
    %cst_49 = arith.constant dense<0.000000e+00> : vector<8xf32>
    %151 = vector.multi_reduction <add>, %150, %cst_49 [1] : vector<8x256xf32> to vector<8xf32>
    %152 = vector.shape_cast %151 : vector<8xf32> to vector<8x1xf32>
    %153 = vector.broadcast %8 : vector<1x1xf32> to vector<8x1xf32>
    %154 = arith.addf %152, %153 : vector<8x1xf32>
    %cst_50 = arith.constant 0.000000e+00 : f32
    %155 = vector.broadcast %cst_50 : f32 to vector<8x1xf32>
    %156 = arith.maximumf %154, %155 : vector<8x1xf32>
    %157 = math.absf %154 : vector<8x1xf32>
    %cst_51 = arith.constant 0.000000e+00 : f32
    %158 = vector.broadcast %cst_51 : f32 to vector<8x1xf32>
    %159 = arith.subf %158, %157 : vector<8x1xf32>
    %160 = math.exp %159 : vector<8x1xf32>
    %161 = math.log1p %160 : vector<8x1xf32>
    %162 = arith.addf %156, %161 : vector<8x1xf32>
    %cst_52 = arith.constant 1.000000e+02 : f32
    %163 = vector.broadcast %cst_52 : f32 to vector<8x1xf32>
    %164 = arith.minimumf %162, %163 : vector<8x1xf32>
    %165 = vector.shape_cast %164 : vector<8x1xf32> to vector<1x8x1xf32>
    %cst_53 = arith.constant dense<0.000000e+00> : vector<1xf32>
    %166 = vector.multi_reduction <add>, %165, %cst_53 [1, 2] : vector<1x8x1xf32> to vector<1xf32>
    %167 = vector.shape_cast %166 : vector<1xf32> to vector<1x1x1xf32>
    %168 = vector.extract %167[0, 0, 0] : f32 from vector<1x1x1xf32>
    %cst_54 = arith.constant 8.000000e+00 : f32
    %169 = arith.divf %168, %cst_54 : f32
    %170 = arith.addf %89, %169 : f32
    %cst_55 = arith.constant 5.000000e-01 : f32
    %171 = arith.mulf %cst_55, %170 : f32
    %c0_56 = arith.constant 0 : index
    %c0_57 = arith.constant 0 : index
    %172 = memref.load %arg4[%c0_56, %c0_57] : memref<1x1xf32, #tpu.memory_space<smem>>
    memref.store %171, %arg4[%c0_56, %c0_57] : memref<1x1xf32, #tpu.memory_space<smem>>
    return
  }
}

</mosaic_0001>

<bundles_post_ra>
// kernel: tpu_custom_call.1
= control target key start
LH: loop header
LB: loop body
LE: loop exit
PB: predicated region body
PF: predicated region fallthrough
CT: control target
= control target key end

     0   :  { %9 = vsyncpa [#allocation3], 0  ;;  %s1729_s0 = inlined_call_operand.hbm [shape: f32[8,256], index: 0, kind: input, shape index: {}]   ;;  %s1730_s1 = inlined_call_operand.hbm [shape: f32[8,256], index: 1, kind: input, shape index: {}]   ;;  %s1731_s2 = inlined_call_operand.hbm [shape: bf16[2,256,256], index: 2, kind: input, shape index: {}]   ;;  %s1732_s3 = inlined_call_operand.hbm [shape: f32[8,256], index: 3, kind: input, shape index: {}]   ;;  %s1733_s4 = inlined_call_operand.hbm [shape: f32[1,1], index: 4, kind: output, shape index: {}]  }
   0x1   :  { %10 = vsyncpa [#allocation6], 0 }
   0x2   :  { %11 = vsyncpa [#allocation9], 0 }
   0x3   :  { %12 = vsyncpa [#allocation4], 0  ;;  %s1340_s15 = smov [#allocation5]   ;;  %s1341_s17 = smov [#allocation2]  }
   0x4   :  { %s29_s16 = sshll.u32 %s1340_s15, 4  ;;  %s19_s18 = sshll.u32 %s1341_s17, 4  ;;  %s30_s16 = int_to_ptr.vmem [resolvable:$true] %s29_s16  ;;  %s20_s18 = int_to_ptr.vmem [resolvable:$true] %s19_s18 }
   0x5   :  { %s1234_s21 = scalar_lea.hbm %s1730_s1, 256 }
   0x6   :  { %p1235_p0 = scmp.ne.s32.totalorder %s1730_s1, %s1234_s21  ;;  %p1238_p1 = scmp.lt.u32.totalorder %s1234_s21, %s1730_s1 }
   0x8   :  { %p1240_p2 = pnand %p1238_p1, %p1235_p0 }
   0xa   :  { %1243 = shalt.err (!%p1240_p2)
}
   0xb   :  { %s1244_s26 = scalar_lea.vmem %s30_s16, 256  ;;  %p1249_p4 = scmp.lt.s32.totalorder %s30_s16, %s30_s16 }
   0xc   :  { %p1245_p3 = scmp.ne.s32.totalorder %s30_s16, %s1244_s26  ;;  %p1250_p5 = scmp.lt.s32.totalorder %s1244_s26, %s1244_s26 }
   0xe   :  { %p1251_p6 = por %p1250_p5, %p1249_p4 }
  0x10   :  { %p1252_p7 = pnand %p1251_p6, %p1245_p3 }
  0x12   :  { %1255 = shalt.err (!%p1252_p7)
}
  0x13   :  { %32 = dma.hbm_to_vmem [thread:$0]  %s1730_s1, 256, %s30_s16, [#allocation6]  }
  0x14   :  { %s1256_s5 = scalar_lea.hbm %s1729_s0, 256 }
  0x15   :  { %p1257_p8 = scmp.ne.s32.totalorder %s1729_s0, %s1256_s5  ;;  %p1260_p9 = scmp.lt.u32.totalorder %s1256_s5, %s1729_s0 }
  0x17   :  { %p1262_p10 = pnand %p1260_p9, %p1257_p8 }
  0x19   :  { %1265 = shalt.err (!%p1262_p10)
}
  0x1a   :  { %s1266_s10 = scalar_lea.vmem %s20_s18, 256  ;;  %p1271_p12 = scmp.lt.s32.totalorder %s20_s18, %s20_s18 }
  0x1b   :  { %p1267_p11 = scmp.ne.s32.totalorder %s20_s18, %s1266_s10  ;;  %p1272_p13 = scmp.lt.s32.totalorder %s1266_s10, %s1266_s10 }
  0x1d   :  { %p1273_p0 = por %p1272_p13, %p1271_p12 }
  0x1f   :  { %p1274_p1 = pnand %p1273_p0, %p1267_p11 }
  0x21   :  { %1277 = shalt.err (!%p1274_p1)
}
  0x22   :  { %22 = dma.hbm_to_vmem [thread:$0]  %s1729_s0, 256, %s20_s18, [#allocation3]  }
  0x23   :  { %s1342_s12 = smov [#allocation7]   ;;  %s1278_s16 = scalar_lea.hbm %s1731_s2, 8192 }
  0x24   :  { %s38_s13 = sshll.u32 %s1342_s12, 4  ;;  %p1279_p2 = scmp.ne.s32.totalorder %s1731_s2, %s1278_s16  ;;  %s39_s13 = int_to_ptr.vmem [resolvable:$true] %s38_s13 }
  0x25   :  { %p1282_p3 = scmp.lt.u32.totalorder %s1278_s16, %s1731_s2 }
  0x27   :  { %p1284_p4 = pnand %p1282_p3, %p1279_p2 }
  0x29   :  { %1287 = shalt.err (!%p1284_p4)
}
  0x2a   :  { %s1288_s22 = scalar_lea.vmem %s39_s13, 8192  ;;  %p1293_p6 = scmp.lt.s32.totalorder %s39_s13, %s39_s13 }
  0x2b   :  { %p1289_p5 = scmp.ne.s32.totalorder %s39_s13, %s1288_s22  ;;  %p1294_p7 = scmp.lt.s32.totalorder %s1288_s22, %s1288_s22 }
  0x2d   :  { %p1295_p8 = por %p1294_p7, %p1293_p6 }
  0x2f   :  { %p1296_p9 = pnand %p1295_p8, %p1289_p5 }
  0x31   :  { %1299 = shalt.err (!%p1296_p9)
}
  0x32   :  { %s1343_s0 = smov 128   ;;  %s1344_s18 = smov 8  }
  0x33   :  { %44 = dma.hbm_to_vmem [thread:$0]  %s1731_s2, 8192, %s39_s13, [#allocation6], %s1343_s0, %s1343_s0, %s1344_s18  }
  0x34   :  { %s1345_s25 = smov [#allocation8]   ;;  %s1300_s29 = scalar_lea.hbm %s1732_s3, 256 }
  0x35   :  { %s51_s26 = sshll.u32 %s1345_s25, 4  ;;  %p1301_p10 = scmp.ne.s32.totalorder %s1732_s3, %s1300_s29  ;;  %s52_s26 = int_to_ptr.vmem [resolvable:$true] %s51_s26 }
  0x36   :  { %p1304_p11 = scmp.lt.u32.totalorder %s1300_s29, %s1732_s3 }
  0x38   :  { %p1306_p12 = pnand %p1304_p11, %p1301_p10 }
  0x3a   :  { %1309 = shalt.err (!%p1306_p12)
}
  0x3b   :  { %s1310_s8 = scalar_lea.vmem %s52_s26, 256  ;;  %p1315_p0 = scmp.lt.s32.totalorder %s52_s26, %s52_s26 }
  0x3c   :  { %p1311_p13 = scmp.ne.s32.totalorder %s52_s26, %s1310_s8  ;;  %p1316_p1 = scmp.lt.s32.totalorder %s1310_s8, %s1310_s8 }
  0x3e   :  { %p1317_p2 = por %p1316_p1, %p1315_p0 }
  0x40   :  { %p1318_p3 = pnand %p1317_p2, %p1311_p13 }
  0x42   :  { %1321 = shalt.err (!%p1318_p3)
}
  0x43   :  { %54 = dma.hbm_to_vmem [thread:$0]  %s1732_s3, 256, %s52_s26, [#allocation9]  }
  0x44   :  { %1332 = dma.done.wait [#allocation3], 256  }
  0x45   :  { %1333 = vsyncadd [#allocation3], 4294967040 }
  0x46   :  { %1334 = dma.done.wait [#allocation6], 8448  }
  0x47   :  { %1335 = vsyncadd [#allocation6], 4294958848 }
  0x48   :  { %1336 = dma.done.wait [#allocation9], 256  }
  0x49   :  { %1337 = vsyncadd [#allocation9], 4294967040  ;;  %v1420_v0 = vld [vmem:[#allocation7 + $0x4] ss:$8 sps:$4 sm:$0xff]   ;;  %v1422_v1 = vld [vmem:[#allocation7] ss:$8 sps:$4 sm:$0xff]  }
  0x4a   :  { %273 = vmatprep.subr.bf16.mxu0 %v1420_v0  ;;  %v1425_v2 = vld [vmem:[#allocation7 + $0x14] ss:$8 sps:$4 sm:$0xff]   ;;  %v1428_v3 = vld [vmem:[#allocation7 + $0x10] ss:$8 sps:$4 sm:$0xff]   ;;  %v1431_v4 = vld [vmem:[#allocation7 + $0x24] ss:$8 sps:$4 sm:$0xff]  }
  0x4b   :  { %274 = vmatpush1.bf16.msra.mxu0 %v1422_v1  ;;  %v1434_v5 = vld [vmem:[#allocation7 + $0x20] ss:$8 sps:$4 sm:$0xff]   ;;  %v1437_v6 = vld [vmem:[#allocation7 + $0x34] ss:$8 sps:$4 sm:$0xff]   ;;  %v1440_v7 = vld [vmem:[#allocation7 + $0x30] ss:$8 sps:$4 sm:$0xff]  }
  0x4c   :  { %275 = vmatprep.subr.bf16.mxu0 %v1425_v2  ;;  %v1443_v8 = vld [vmem:[#allocation7 + $0x44] ss:$8 sps:$4 sm:$0xff]   ;;  %v1446_v9 = vld [vmem:[#allocation7 + $0x40] ss:$8 sps:$4 sm:$0xff]   ;;  %v1449_v10 = vld [vmem:[#allocation7 + $0x54] ss:$8 sps:$4 sm:$0xff]  }
  0x4d   :  { %v1452_v11 = vld [vmem:[#allocation7 + $0x50] ss:$8 sps:$4 sm:$0xff]   ;;  %v1455_v12 = vld [vmem:[#allocation7 + $0x64] ss:$8 sps:$4 sm:$0xff]   ;;  %v1457_v14 = vld [vmem:[#allocation7 + $0x60] ss:$8 sps:$4 sm:$0xff]  }
  0x4e   :  { %v70_v13 = vld [vmem:[#allocation2 + $0x8] sm:$0xff]  ;;  %v1459_v15 = vld [vmem:[#allocation7 + $0x74] ss:$8 sps:$4 sm:$0xff]   ;;  %v1469_v20 = vld [vmem:[#allocation7 + $0x70] ss:$8 sps:$4 sm:$0xff]   ;;  %vm738_vm1 = vcmask 7168  }
  0x4f   :  { %276 = vmatpush1.bf16.msra.mxu0 %v1428_v3  ;;  %v72_v16 = vpack.c.bf16 %v70_v13, %v70_v13  ;;  %v1462_v17 = vld [vmem:[#allocation7 + $0x104] ss:$8 sps:$4 sm:$0xff]   ;;  %v1464_v18 = vld [vmem:[#allocation7 + $0x100] ss:$8 sps:$4 sm:$0xff]   ;;  %v1467_v19 = vld [vmem:[#allocation7 + $0x114] ss:$8 sps:$4 sm:$0xff]  }
  0x50   :  { %277 = vmatprep.subr.bf16.mxu0 %v1431_v4  ;;  %590 = vmatprep.subr.bf16.mxu1 %v1462_v17  ;;  %v1472_v21 = vld [vmem:[#allocation7 + $0x84] ss:$8 sps:$4 sm:$0xff]   ;;  %v1475_v22 = vld [vmem:[#allocation7 + $0x110] ss:$8 sps:$4 sm:$0xff]   ;;  %v1482_v24 = vld [vmem:[#allocation7 + $0x120] ss:$8 sps:$4 sm:$0xff]  }
  0x51   :  { %305 = vmatprep.mubr.bf16.mxu0 %v72_v16  ;;  %591 = vmatpush1.bf16.msra.mxu1 %v1464_v18  ;;  %v1477_v23 = vld [vmem:[#allocation7 + $0x124] ss:$8 sps:$4 sm:$0xff]   ;;  %v1140_v25 = vld [vmem:[#allocation7 + $0x80] ss:$8 sps:$4 sm:$0xff]   ;;  %v1141_v26 = vld [vmem:[#allocation7 + $0x94] ss:$8 sps:$4 sm:$0xff]  }
  0x52   :  { %592 = vmatprep.subr.bf16.mxu1 %v1467_v19  ;;  %v1143_v27 = vld [vmem:[#allocation7 + $0x90] ss:$8 sps:$4 sm:$0xff]   ;;  %v1144_v28 = vld [vmem:[#allocation7 + $0xa4] ss:$8 sps:$4 sm:$0xff]   ;;  %v1146_v29 = vld [vmem:[#allocation7 + $0xa0] ss:$8 sps:$4 sm:$0xff]  }
  0x53   :  { %278 = vmatpush1.bf16.msra.mxu0 %v1434_v5  ;;  %v1147_v30 = vld [vmem:[#allocation7 + $0xb4] ss:$8 sps:$4 sm:$0xff]   ;;  %v1149_v31 = vld [vmem:[#allocation7 + $0xb0] ss:$8 sps:$4 sm:$0xff]   ;;  %v1150_v32 = vld [vmem:[#allocation7 + $0xc4] ss:$8 sps:$4 sm:$0xff]  }
  0x54   :  { %279 = vmatprep.subr.bf16.mxu0 %v1437_v6  ;;  %v1152_v33 = vld [vmem:[#allocation7 + $0xc0] ss:$8 sps:$4 sm:$0xff]   ;;  %v1153_v34 = vld [vmem:[#allocation7 + $0xd4] ss:$8 sps:$4 sm:$0xff]   ;;  %v1155_v35 = vld [vmem:[#allocation7 + $0xd0] ss:$8 sps:$4 sm:$0xff]  }
  0x55   :  { %593 = vmatpush1.bf16.msra.mxu1 %v1475_v22  ;;  %v1156_v36 = vld [vmem:[#allocation7 + $0xe4] ss:$8 sps:$4 sm:$0xff]   ;;  %v1158_v37 = vld [vmem:[#allocation7 + $0xe0] ss:$8 sps:$4 sm:$0xff]   ;;  %v1159_v38 = vld [vmem:[#allocation7 + $0xf4] ss:$8 sps:$4 sm:$0xff]  }
  0x56   :  { %594 = vmatprep.subr.bf16.mxu1 %v1477_v23  ;;  %v1161_v39 = vld [vmem:[#allocation7 + $0xf0] ss:$8 sps:$4 sm:$0xff]   ;;  %v69_v40 = vld [vmem:[#allocation2] sm:$0xff]  ;;  %v1506_v46 = vld [vmem:[#allocation7 + $0x134] ss:$8 sps:$4 sm:$0xff]   ;;  %s1322_s16 = scalar_lea.hbm %s1733_s4, 16 }
  0x57   :  { %280 = vmatpush1.bf16.msra.mxu0 %v1440_v7  ;;  %v753_v41 = vld [vmem:[#allocation5 + $0x8] sm:$0xff]  ;;  %v71_v42 = vpack.c.bf16 %v69_v40, %v69_v40  ;;  %v752_v44 = vld [vmem:[#allocation5] sm:$0xff]  ;;  %v1512_v48 = vld [vmem:[#allocation7 + $0x144] ss:$8 sps:$4 sm:$0xff]   ;;  %p1323_p4 = scmp.ne.s32.totalorder %s1733_s4, %s1322_s16  ;;  %p1326_p5 = scmp.lt.u32.totalorder %s1322_s16, %s1733_s4 }
  0x58   :  { %281 = vmatprep.subr.bf16.mxu0 %v1443_v8  ;;  %v755_v43 = vpack.c.bf16 %v753_v41, %v753_v41  ;;  %v754_v45 = vpack.c.bf16 %v752_v44, %v752_v44  ;;  %v1508_v47 = vld [vmem:[#allocation7 + $0x130] ss:$8 sps:$4 sm:$0xff]   ;;  %v1514_v49 = vld [vmem:[#allocation7 + $0x140] ss:$8 sps:$4 sm:$0xff]   ;;  %v1518_v50 = vld [vmem:[#allocation7 + $0x154] ss:$8 sps:$4 sm:$0xff]  }
  0x59   :  { %595 = vmatpush1.bf16.msra.mxu1 %v1482_v24  ;;  %v1520_v51 = vld [vmem:[#allocation7 + $0x150] ss:$8 sps:$4 sm:$0xff]   ;;  %v1524_v52 = vld [vmem:[#allocation7 + $0x164] ss:$8 sps:$4 sm:$0xff]   ;;  %v1526_v53 = vld [vmem:[#allocation7 + $0x160] ss:$8 sps:$4 sm:$0xff]   ;;  %p1328_p6 = pnand %p1326_p5, %p1323_p4 }
  0x5a   :  { %596 = vmatprep.subr.bf16.mxu1 %v1506_v46  ;;  %v1530_v54 = vld [vmem:[#allocation7 + $0x174] ss:$8 sps:$4 sm:$0xff]   ;;  %v1532_v55 = vld [vmem:[#allocation7 + $0x170] ss:$8 sps:$4 sm:$0xff]   ;;  %v1536_v56 = vld [vmem:[#allocation7 + $0x184] ss:$8 sps:$4 sm:$0xff]  }
  0x5b   :  { %282 = vmatpush1.bf16.msra.mxu0 %v1446_v9  ;;  %v1538_v57 = vld [vmem:[#allocation7 + $0x180] ss:$8 sps:$4 sm:$0xff]   ;;  %v1542_v58 = vld [vmem:[#allocation7 + $0x194] ss:$8 sps:$4 sm:$0xff]   ;;  %v1544_v59 = vld [vmem:[#allocation7 + $0x190] ss:$8 sps:$4 sm:$0xff]  }
  0x5c   :  { %283 = vmatprep.subr.bf16.mxu0 %v1449_v10  ;;  %v1546_v60 = vld [vmem:[#allocation7 + $0x1a4] ss:$8 sps:$4 sm:$0xff]   ;;  %v1550_v61 = vld [vmem:[#allocation7 + $0x1a0] ss:$8 sps:$4 sm:$0xff]   ;;  %v1553_v62 = vld [vmem:[#allocation7 + $0x1b4] ss:$8 sps:$4 sm:$0xff]  }
  0x5d   :  { %597 = vmatpush1.bf16.msra.mxu1 %v1508_v47  ;;  %v1556_v63 = vld [vmem:[#allocation7 + $0x1b0] ss:$8 sps:$4 sm:$0xff]  }
  0x5e   :  { %598 = vmatprep.subr.bf16.mxu1 %v1512_v48 }
  0x5f   :  { %284 = vmatpush1.bf16.msra.mxu0 %v1452_v11 }
  0x60   :  { %285 = vmatprep.subr.bf16.mxu0 %v1455_v12 }
  0x61   :  { %599 = vmatpush1.bf16.msra.mxu1 %v1514_v49 }
  0x62   :  { %600 = vmatprep.subr.bf16.mxu1 %v1518_v50 }
  0x63   :  { %286 = vmatpush1.bf16.msra.mxu0 %v1457_v14 }
  0x64   :  { %287 = vmatprep.subr.bf16.mxu0 %v1459_v15 }
  0x65   :  { %601 = vmatpush1.bf16.msra.mxu1 %v1520_v51 }
  0x66   :  { %602 = vmatprep.subr.bf16.mxu1 %v1524_v52 }
  0x67   :  { %288 = vmatpush1.bf16.msra.mxu0 %v1469_v20 }
  0x68   :  { %289 = vmatprep.subr.bf16.mxu0 %v1472_v21 }
  0x69   :  { %603 = vmatpush1.bf16.msra.mxu1 %v1526_v53 }
  0x6a   :  { %604 = vmatprep.subr.bf16.mxu1 %v1530_v54 }
  0x6b   :  { %290 = vmatpush1.bf16.msra.mxu0 %v1140_v25 }
  0x6c   :  { %291 = vmatprep.subr.bf16.mxu0 %v1141_v26 }
  0x6d   :  { %605 = vmatpush1.bf16.msra.mxu1 %v1532_v55 }
  0x6e   :  { %606 = vmatprep.subr.bf16.mxu1 %v1536_v56 }
  0x6f   :  { %292 = vmatpush1.bf16.msra.mxu0 %v1143_v27 }
  0x70   :  { %293 = vmatprep.subr.bf16.mxu0 %v1144_v28 }
  0x71   :  { %607 = vmatpush1.bf16.msra.mxu1 %v1538_v57 }
  0x72   :  { %608 = vmatprep.subr.bf16.mxu1 %v1542_v58 }
  0x73   :  { %294 = vmatpush1.bf16.msra.mxu0 %v1146_v29 }
  0x74   :  { %295 = vmatprep.subr.bf16.mxu0 %v1147_v30 }
  0x75   :  { %609 = vmatpush1.bf16.msra.mxu1 %v1544_v59 }
  0x76   :  { %610 = vmatprep.subr.bf16.mxu1 %v1546_v60 }
  0x77   :  { %296 = vmatpush1.bf16.msra.mxu0 %v1149_v31 }
  0x78   :  { %297 = vmatprep.subr.bf16.mxu0 %v1150_v32 }
  0x79   :  { %611 = vmatpush1.bf16.msra.mxu1 %v1550_v61 }
  0x7a   :  { %612 = vmatprep.subr.bf16.mxu1 %v1553_v62 }
  0x7b   :  { %298 = vmatpush1.bf16.msra.mxu0 %v1152_v33 }
  0x7c   :  { %299 = vmatprep.subr.bf16.mxu0 %v1153_v34 }
  0x7d   :  { %613 = vmatpush1.bf16.msra.mxu1 %v1556_v63 }
  0x7f   :  { %300 = vmatpush1.bf16.msra.mxu0 %v1155_v35 }
  0x80   :  { %301 = vmatprep.subr.bf16.mxu0 %v1156_v36 }
  0x83   :  { %302 = vmatpush1.bf16.msra.mxu0 %v1158_v37 }
  0x84   :  { %303 = vmatprep.subr.bf16.mxu0 %v1159_v38 }
  0x87   :  { %304 = vmatpush1.bf16.msra.mxu0 %v1161_v39 }
  0x88   :  { %756 = vmatprep.subr.bf16.mxu0 %v1420_v0  ;;  %v1559_v0 = vld [vmem:[#allocation7 + $0x1c4] ss:$8 sps:$4 sm:$0xff]  }
  0x89   :  { %614 = vmatprep.subr.bf16.mxu1 %v1559_v0 }
  0x8a   :  { %306 = vmatmul.mubr.bf16.vlgmr.msra.gmra.mrb[0].mxu0 %v71_v42 }
  0x8b   :  { %757 = vmatpush1.bf16.msra.mxu0 %v1422_v1  ;;  %788 = vmatprep.mubr.bf16.mxu0 %v755_v43  ;;  %v1562_v1 = vld [vmem:[#allocation7 + $0x1c0] ss:$8 sps:$4 sm:$0xff]  }
  0x8c   :  { %758 = vmatprep.subr.bf16.mxu0 %v1425_v2  ;;  %v1565_v2 = vld [vmem:[#allocation7 + $0x1d4] ss:$8 sps:$4 sm:$0xff]   ;;  %615 = vmatpush1.bf16.msra.mxu1 %v1562_v1 }
  0x8d   :  { %616 = vmatprep.subr.bf16.mxu1 %v1565_v2 }
  0x8f   :  { %759 = vmatpush1.bf16.msra.mxu0 %v1428_v3  ;;  %v1568_v3 = vld [vmem:[#allocation7 + $0x1d0] ss:$8 sps:$4 sm:$0xff]  }
  0x90   :  { %760 = vmatprep.subr.bf16.mxu0 %v1431_v4  ;;  %v1571_v4 = vld [vmem:[#allocation7 + $0x1e4] ss:$8 sps:$4 sm:$0xff]   ;;  %617 = vmatpush1.bf16.msra.mxu1 %v1568_v3 }
  0x91   :  { %618 = vmatprep.subr.bf16.mxu1 %v1571_v4 }
  0x93   :  { %761 = vmatpush1.bf16.msra.mxu0 %v1434_v5  ;;  %v1574_v5 = vld [vmem:[#allocation7 + $0x1e0] ss:$8 sps:$4 sm:$0xff]  }
  0x94   :  { %762 = vmatprep.subr.bf16.mxu0 %v1437_v6  ;;  %v1577_v6 = vld [vmem:[#allocation7 + $0x1f4] ss:$8 sps:$4 sm:$0xff]   ;;  %619 = vmatpush1.bf16.msra.mxu1 %v1574_v5 }
  0x95   :  { %620 = vmatprep.subr.bf16.mxu1 %v1577_v6 }
  0x97   :  { %763 = vmatpush1.bf16.msra.mxu0 %v1440_v7  ;;  %v1580_v7 = vld [vmem:[#allocation7 + $0x1f0] ss:$8 sps:$4 sm:$0xff]  }
  0x98   :  { %764 = vmatprep.subr.bf16.mxu0 %v1443_v8  ;;  %1735 = vst [vmem:[#allocation15_spill] sm:$0xff] %v1580_v7  ;;  %621 = vmatpush1.bf16.msra.mxu1 %v1580_v7  ;;  %v105_v8 = vlaneseq }
  0x99   :  { %871 = vmatprep.subr.bf16.mxu1 %v1462_v17 }
  0x9b   :  { %765 = vmatpush1.bf16.msra.mxu0 %v1446_v9  ;;  %v1585_v9 = vshrl.u32 %v105_v8, 7 }
  0x9c   :  { %766 = vmatprep.subr.bf16.mxu0 %v1449_v10 }
  0x9d   :  { %v107_v10 = vsub.s32 0, %v1585_v9 }
  0x9f   :  { %767 = vmatpush1.bf16.msra.mxu0 %v1452_v11  ;;  %v1588_v11 = vld [vmem:[#allocation8] sm:$0xff] }
  0xa0   :  { %768 = vmatprep.subr.bf16.mxu0 %v1455_v12  ;;  %v1590_v12 = vld [vmem:[#allocation8 + $0x8] sm:$0xff]  ;;  %v1593_v13 = vrot.slane %v1588_v11, %v107_v10 }
  0xa3   :  { %769 = vmatpush1.bf16.msra.mxu0 %v1457_v14  ;;  %v1596_v14 = vrot.slane %v1590_v12, %v107_v10 }
  0xa4   :  { %770 = vmatprep.subr.bf16.mxu0 %v1459_v15 }
  0xa7   :  { %771 = vmatpush1.bf16.msra.mxu0 %v1469_v20 }
  0xa8   :  { %772 = vmatprep.subr.bf16.mxu0 %v1472_v21 }
  0xab   :  { %773 = vmatpush1.bf16.msra.mxu0 %v1140_v25 }
  0xac   :  { %774 = vmatprep.subr.bf16.mxu0 %v1141_v26 }
  0xaf   :  { %775 = vmatpush1.bf16.msra.mxu0 %v1143_v27 }
  0xb0   :  { %776 = vmatprep.subr.bf16.mxu0 %v1144_v28 }
  0xb3   :  { %777 = vmatpush1.bf16.msra.mxu0 %v1146_v29 }
  0xb4   :  { %778 = vmatprep.subr.bf16.mxu0 %v1147_v30 }
  0xb7   :  { %779 = vmatpush1.bf16.msra.mxu0 %v1149_v31 }
  0xb8   :  { %780 = vmatprep.subr.bf16.mxu0 %v1150_v32 }
  0xbb   :  { %781 = vmatpush1.bf16.msra.mxu0 %v1152_v33 }
  0xbc   :  { %782 = vmatprep.subr.bf16.mxu0 %v1153_v34 }
  0xbf   :  { %783 = vmatpush1.bf16.msra.mxu0 %v1155_v35 }
  0xc0   :  { %784 = vmatprep.subr.bf16.mxu0 %v1156_v36 }
  0xc3   :  { %785 = vmatpush1.bf16.msra.mxu0 %v1158_v37 }
  0xc4   :  { %786 = vmatprep.subr.bf16.mxu0 %v1159_v38 }
  0xc7   :  { %787 = vmatpush1.bf16.msra.mxu0 %v1161_v39 }
  0xca   :  { %789 = vmatmul.mubr.bf16.vlgmr.msra.gmra.mrb[4].mxu0 %v754_v45 }
 0x15d   :  { %v307_v15 = vpop.f32.mrb[0].mxu0 }
 0x15e   :  { %v308_v16 = vadd.f32 %v307_v15, %v1593_v13  ;;  %v309_v20 = vpop.f32.mrb[1].mxu0 }
 0x15f   :  { %v310_v17 = vadd.f32 %v309_v20, %v1596_v14  ;;  %v311_v21 = vpop.f32.mrb[2].mxu0 }
 0x160   :  { %v314_v25 = vrot.slane %v308_v16, 4  ;;  %v329_v26 = vmul.f32 %v308_v16, %v308_v16  ;;  %v312_v27 = vpop.f32.mrb[3].mxu0 }
 0x161   :  { %v320_v28 = vrot.slane %v310_v17, 4  ;;  %v330_v29 = vmul.f32 %v310_v17, %v310_v17 }
 0x162   :  { %v315_v30 = vadd.f32 %v314_v25, %v308_v16  ;;  %v331_v31 = vrot.slane %v329_v26, 4 }
 0x163   :  { %v321_v32 = vadd.f32 %v320_v28, %v310_v17  ;;  %v337_v33 = vrot.slane %v330_v29, 4 }
 0x164   :  { %v316_v34 = vrot.slane %v315_v30, 2  ;;  %v332_v35 = vadd.f32 %v331_v31, %v329_v26 }
 0x165   :  { %v322_v36 = vrot.slane %v321_v32, 2  ;;  %v338_v37 = vadd.f32 %v337_v33, %v330_v29 }
 0x166   :  { %v317_v38 = vadd.f32 %v316_v34, %v315_v30  ;;  %v333_v39 = vrot.slane %v332_v35, 2 }
 0x167   :  { %v323_v40 = vadd.f32 %v322_v36, %v321_v32  ;;  %v339_v41 = vrot.slane %v338_v37, 2 }
 0x168   :  { %v318_v42 = vrot.slane %v317_v38, 1  ;;  %v334_v43 = vadd.f32 %v333_v39, %v332_v35 }
 0x169   :  { %v340_v44 = vadd.f32 %v339_v41, %v338_v37  ;;  %v324_v45 = vrot.slane %v323_v40, 1  ;;  %v1601_v37 = vsub.s32 1, %v1585_v9 }
 0x16a   :  { %v319_v8 = vadd.f32 %v318_v42, %v317_v38  ;;  %v335_v10 = vrot.slane %v334_v43, 1  ;;  %v1606_v42 = vsub.s32 2, %v1585_v9 }
 0x16b   :  { %v341_v15 = vrot.slane %v340_v44, 1  ;;  %v325_v20 = vadd.f32 %v324_v45, %v323_v40 }
 0x16c   :  { %v327_v21 = vmul.f32 0.125, %v319_v8  ;;  %v336_v25 = vadd.f32 %v335_v10, %v334_v43 }
 0x16d   :  { %v342_v27 = vadd.f32 %v341_v15, %v340_v44  ;;  %v328_v28 = vmul.f32 0.125, %v325_v20 }
 0x16e   :  { %v343_v7 = vmul.f32 0.125, %v336_v25  ;;  %v345_v26 = vmul.f32 %v327_v21, %v327_v21 }
 0x16f   :  { %v344_v31 = vmul.f32 0.125, %v342_v27  ;;  %v346_v29 = vmul.f32 %v328_v28, %v328_v28 }
 0x170   :  { %v347_v30 = vsub.f32 %v343_v7, %v345_v26 }
 0x171   :  { %v348_v33 = vsub.f32 %v344_v31, %v346_v29 }
 0x172   :  { %v349_v32 = vadd.f32 1e-05, %v347_v30 }
 0x173   :  { %v350_v34 = vadd.f32 1e-05, %v348_v33 }
 0x174   :  { %1210 = vrsqrt.f32 %v349_v32 }
 0x175   :  { %1212 = vrsqrt.f32 %v350_v34 }
 0x17e   :  { %v1211_v35 = vpop.eup %1210 }
 0x17f   :  { %v1213_v36 = vpop.eup %1212  ;;  %v353_v38 = vmul.f32 %v1211_v35, %v1588_v11 }
 0x180   :  { %v354_v39 = vmul.f32 %v1213_v36, %v1590_v12 }
 0x181   :  { %v355_v40 = vmul.f32 %v353_v38, %v327_v21  ;;  %v368_v43 = vrot.slane %v353_v38, %v1601_v37 }
 0x182   :  { %v356_v41 = vmul.f32 %v354_v39, %v328_v28  ;;  %v372_v45 = vrot.slane %v354_v39, %v1601_v37 }
 0x183   :  { %v359_v7 = vrot.slane %v355_v40, 7  ;;  %v373_v15 = vmul.f32 %v368_v43, %v308_v16 }
 0x184   :  { %v360_v44 = vrot.slane %v356_v41, 7  ;;  %v374_v25 = vmul.f32 %v372_v45, %v310_v17 }
 0x185   :  { %v363_v8 = vsub.f32 %v1588_v11, %v359_v7 }
 0x186   :  { %v364_v10 = vsub.f32 %v1590_v12, %v360_v44 }
 0x187   :  { %v378_v20 = vrot.slane %v363_v8, %v1606_v42 }
 0x188   :  { %v382_v21 = vrot.slane %v364_v10, %v1606_v42 }
 0x189   :  { %v383_v27 = vadd.f32 %v378_v20, %v373_v15 }
 0x18a   :  { %v384_v28 = vadd.f32 %v382_v21, %v374_v25 }
 0x18b   :  { %v385_v26 = vmax.f32 %v383_v27, 0.0 }
 0x18c   :  { %v386_v31 = vmax.f32 %v384_v28, 0.0 }
 0x18d   :  { %v387_v30 = vpack.c.bf16 %v385_v26, %v385_v26 }
 0x18e   :  { %v388_v29 = vpack.c.bf16 %v386_v31, %v386_v31 }
 0x190   :  { %622 = vmatprep.mubr.bf16.mxu1 %v388_v29 }
 0x191   :  { %623 = vmatmul.mubr.bf16.vlgmr.msra.gmra.mrb[0].mxu1 %v387_v30 }
 0x192   :  { %872 = vmatpush1.bf16.msra.mxu1 %v1464_v18 }
 0x193   :  { %873 = vmatprep.subr.bf16.mxu1 %v1467_v19 }
 0x196   :  { %874 = vmatpush1.bf16.msra.mxu1 %v1475_v22 }
 0x197   :  { %875 = vmatprep.subr.bf16.mxu1 %v1477_v23 }
 0x19a   :  { %876 = vmatpush1.bf16.msra.mxu1 %v1482_v24 }
 0x19b   :  { %877 = vmatprep.subr.bf16.mxu1 %v1506_v46 }
 0x19d   :  { %v790_v16 = vpop.f32.mrb[4].mxu0 }
 0x19e   :  { %v1621_v17 = vadd.f32 %v790_v16, %v1593_v13  ;;  %v792_v33 = vpop.f32.mrb[5].mxu0  ;;  %878 = vmatpush1.bf16.msra.mxu1 %v1508_v47 }
 0x19f   :  { %v1625_v32 = vadd.f32 %v792_v33, %v1596_v14  ;;  %v794_v18 = vpop.f32.mrb[6].mxu0  ;;  %879 = vmatprep.subr.bf16.mxu1 %v1512_v48 }
 0x1a0   :  { %v797_v19 = vrot.slane %v1621_v17, 4  ;;  %v811_v22 = vmul.f32 %v1621_v17, %v1621_v17  ;;  %v795_v23 = vpop.f32.mrb[7].mxu0 }
 0x1a1   :  { %v803_v24 = vrot.slane %v1625_v32, 4  ;;  %v812_v46 = vmul.f32 %v1625_v32, %v1625_v32  ;;  %v1736_v23 = vld [vmem:[#allocation15_spill] sm:$0xff] }
 0x1a2   :  { %v798_v13 = vadd.f32 %v797_v19, %v1621_v17  ;;  %v813_v47 = vrot.slane %v811_v22, 4  ;;  %880 = vmatpush1.bf16.msra.mxu1 %v1514_v49 }
 0x1a3   :  { %v804_v14 = vadd.f32 %v803_v24, %v1625_v32  ;;  %v819_v34 = vrot.slane %v812_v46, 4  ;;  %881 = vmatprep.subr.bf16.mxu1 %v1518_v50 }
 0x1a4   :  { %v799_v48 = vrot.slane %v798_v13, 2  ;;  %v814_v35 = vadd.f32 %v813_v47, %v811_v22 }
 0x1a5   :  { %v805_v36 = vrot.slane %v804_v14, 2  ;;  %v820_v38 = vadd.f32 %v819_v34, %v812_v46 }
 0x1a6   :  { %v800_v39 = vadd.f32 %v799_v48, %v798_v13  ;;  %v815_v40 = vrot.slane %v814_v35, 2  ;;  %882 = vmatpush1.bf16.msra.mxu1 %v1520_v51 }
 0x1a7   :  { %v806_v41 = vadd.f32 %v805_v36, %v804_v14  ;;  %v821_v7 = vrot.slane %v820_v38, 2  ;;  %883 = vmatprep.subr.bf16.mxu1 %v1524_v52 }
 0x1a8   :  { %v801_v43 = vrot.slane %v800_v39, 1  ;;  %v816_v44 = vadd.f32 %v815_v40, %v814_v35 }
 0x1a9   :  { %v807_v49 = vrot.slane %v806_v41, 1  ;;  %v822_v45 = vadd.f32 %v821_v7, %v820_v38 }
 0x1aa   :  { %v802_v8 = vadd.f32 %v801_v43, %v800_v39  ;;  %v817_v10 = vrot.slane %v816_v44, 1  ;;  %884 = vmatpush1.bf16.msra.mxu1 %v1526_v53 }
 0x1ab   :  { %v808_v50 = vadd.f32 %v807_v49, %v806_v41  ;;  %v823_v15 = vrot.slane %v822_v45, 1  ;;  %885 = vmatprep.subr.bf16.mxu1 %v1530_v54 }
 0x1ac   :  { %v809_v20 = vmul.f32 0.125, %v802_v8  ;;  %v818_v25 = vadd.f32 %v817_v10, %v816_v44 }
 0x1ad   :  { %v810_v21 = vmul.f32 0.125, %v808_v50  ;;  %v824_v51 = vadd.f32 %v823_v15, %v822_v45 }
 0x1ae   :  { %v825_v27 = vmul.f32 0.125, %v818_v25  ;;  %v827_v28 = vmul.f32 %v809_v20, %v809_v20  ;;  %886 = vmatpush1.bf16.msra.mxu1 %v1532_v55 }
 0x1af   :  { %v826_v52 = vmul.f32 0.125, %v824_v51  ;;  %v828_v26 = vmul.f32 %v810_v21, %v810_v21  ;;  %887 = vmatprep.subr.bf16.mxu1 %v1536_v56 }
 0x1b0   :  { %v829_v31 = vsub.f32 %v825_v27, %v827_v28 }
 0x1b1   :  { %v830_v29 = vsub.f32 %v826_v52, %v828_v26 }
 0x1b2   :  { %v831_v30 = vadd.f32 1e-05, %v829_v31  ;;  %888 = vmatpush1.bf16.msra.mxu1 %v1538_v57 }
 0x1b3   :  { %v832_v53 = vadd.f32 1e-05, %v830_v29  ;;  %889 = vmatprep.subr.bf16.mxu1 %v1542_v58 }
 0x1b4   :  { %1214 = vrsqrt.f32 %v831_v30 }
 0x1b5   :  { %1216 = vrsqrt.f32 %v832_v53 }
 0x1b6   :  { %890 = vmatpush1.bf16.msra.mxu1 %v1544_v59 }
 0x1b7   :  { %891 = vmatprep.subr.bf16.mxu1 %v1546_v60 }
 0x1ba   :  { %892 = vmatpush1.bf16.msra.mxu1 %v1550_v61 }
 0x1bb   :  { %893 = vmatprep.subr.bf16.mxu1 %v1553_v62 }
 0x1be   :  { %v1215_v54 = vpop.eup %1214  ;;  %894 = vmatpush1.bf16.msra.mxu1 %v1556_v63 }
 0x1bf   :  { %v1217_v55 = vpop.eup %1216  ;;  %v835_v56 = vmul.f32 %v1215_v54, %v1588_v11  ;;  %895 = vmatprep.subr.bf16.mxu1 %v1559_v0 }
 0x1c0   :  { %v836_v57 = vmul.f32 %v1217_v55, %v1590_v12 }
 0x1c1   :  { %v837_v58 = vmul.f32 %v835_v56, %v809_v20  ;;  %v850_v60 = vrot.slane %v835_v56, %v1601_v37 }
 0x1c2   :  { %896 = vmatpush1.bf16.msra.mxu1 %v1562_v1  ;;  %v838_v59 = vmul.f32 %v836_v57, %v810_v21  ;;  %v854_v16 = vrot.slane %v836_v57, %v1601_v37 }
 0x1c3   :  { %897 = vmatprep.subr.bf16.mxu1 %v1565_v2  ;;  %v841_v61 = vrot.slane %v837_v58, 7  ;;  %v855_v33 = vmul.f32 %v850_v60, %v1621_v17 }
 0x1c4   :  { %v842_v62 = vrot.slane %v838_v59, 7  ;;  %v856_v18 = vmul.f32 %v854_v16, %v1625_v32 }
 0x1c5   :  { %v845_v63 = vsub.f32 %v1588_v11, %v841_v61 }
 0x1c6   :  { %898 = vmatpush1.bf16.msra.mxu1 %v1568_v3  ;;  %v846_v0 = vsub.f32 %v1590_v12, %v842_v62 }
 0x1c7   :  { %899 = vmatprep.subr.bf16.mxu1 %v1571_v4  ;;  %v860_v1 = vrot.slane %v845_v63, %v1606_v42  ;;  %v424_v4 = vsub.s32 3, %v1585_v9  ;;  %v1680_v63 = vsub.s32 4, %v1585_v9 }
 0x1c8   :  { %v864_v2 = vrot.slane %v846_v0, %v1606_v42 }
 0x1c9   :  { %v865_v19 = vadd.f32 %v860_v1, %v855_v33  ;;  %v1671_v32 = vrot.slane %v1588_v11, %v424_v4  ;;  %v1674_v42 = vrot.slane %v1590_v12, %v424_v4 }
 0x1ca   :  { %900 = vmatpush1.bf16.msra.mxu1 %v1574_v5  ;;  %v866_v37 = vadd.f32 %v864_v2, %v856_v18 }
 0x1cb   :  { %901 = vmatprep.subr.bf16.mxu1 %v1577_v6  ;;  %v867_v22 = vmax.f32 %v865_v19, 0.0  ;;  %v1685_v19 = vsub.s32 5, %v1585_v9 }
 0x1cc   :  { %v868_v3 = vmax.f32 %v866_v37, 0.0 }
 0x1cd   :  { %v869_v17 = vpack.c.bf16 %v867_v22, %v867_v22 }
 0x1ce   :  { %902 = vmatpush1.bf16.msra.mxu1 %v1736_v23  ;;  %v870_v24 = vpack.c.bf16 %v868_v3, %v868_v3  ;;  %v705_v23 = vsub.s32 6, %v1585_v9 }
 0x1d0   :  { %903 = vmatprep.mubr.bf16.mxu1 %v870_v24 }
 0x1d1   :  { %904 = vmatmul.mubr.bf16.vlgmr.msra.gmra.mrb[4].mxu1 %v869_v17 }
 0x264   :  { %v624_v5 = vpop.f32.mrb[0].mxu1 }
 0x265   :  { %v625_v46 = vadd.f32 %v624_v5, %v1671_v32  ;;  %v626_v6 = vpop.f32.mrb[1].mxu1 }
 0x266   :  { %v627_v13 = vadd.f32 %v626_v6, %v1674_v42  ;;  %v628_v47 = vpop.f32.mrb[2].mxu1 }
 0x267   :  { %v631_v14 = vrot.slane %v625_v46, 4  ;;  %v645_v34 = vmul.f32 %v625_v46, %v625_v46  ;;  %v629_v48 = vpop.f32.mrb[3].mxu1 }
 0x268   :  { %v637_v35 = vrot.slane %v627_v13, 4  ;;  %v646_v36 = vmul.f32 %v627_v13, %v627_v13  ;;  %v1697_v48 = vrot.slane %v1590_v12, %v705_v23 }
 0x269   :  { %v632_v38 = vadd.f32 %v631_v14, %v625_v46  ;;  %v647_v39 = vrot.slane %v645_v34, 4  ;;  %v1694_v14 = vrot.slane %v1588_v11, %v705_v23 }
 0x26a   :  { %v638_v40 = vadd.f32 %v637_v35, %v627_v13  ;;  %v653_v41 = vrot.slane %v646_v36, 4 }
 0x26b   :  { %v633_v7 = vrot.slane %v632_v38, 2  ;;  %v648_v43 = vadd.f32 %v647_v39, %v645_v34 }
 0x26c   :  { %v639_v44 = vrot.slane %v638_v40, 2  ;;  %v654_v49 = vadd.f32 %v653_v41, %v646_v36 }
 0x26d   :  { %v634_v45 = vadd.f32 %v633_v7, %v632_v38  ;;  %v649_v8 = vrot.slane %v648_v43, 2 }
 0x26e   :  { %v640_v10 = vadd.f32 %v639_v44, %v638_v40  ;;  %v655_v50 = vrot.slane %v654_v49, 2 }
 0x26f   :  { %v635_v15 = vrot.slane %v634_v45, 1  ;;  %v650_v20 = vadd.f32 %v649_v8, %v648_v43 }
 0x270   :  { %v641_v25 = vrot.slane %v640_v10, 1  ;;  %v656_v21 = vadd.f32 %v655_v50, %v654_v49 }
 0x271   :  { %v636_v51 = vadd.f32 %v635_v15, %v634_v45  ;;  %v651_v27 = vrot.slane %v650_v20, 1 }
 0x272   :  { %v642_v28 = vadd.f32 %v641_v25, %v640_v10  ;;  %v657_v52 = vrot.slane %v656_v21, 1 }
 0x273   :  { %v652_v26 = vadd.f32 %v651_v27, %v650_v20  ;;  %v643_v31 = vmul.f32 0.125, %v636_v51 }
 0x274   :  { %v658_v29 = vadd.f32 %v657_v52, %v656_v21  ;;  %v644_v30 = vmul.f32 0.125, %v642_v28 }
 0x275   :  { %v659_v53 = vmul.f32 0.125, %v652_v26  ;;  %v661_v54 = vmul.f32 %v643_v31, %v643_v31 }
 0x276   :  { %v660_v55 = vmul.f32 0.125, %v658_v29  ;;  %v662_v56 = vmul.f32 %v644_v30, %v644_v30 }
 0x277   :  { %v663_v57 = vsub.f32 %v659_v53, %v661_v54 }
 0x278   :  { %v664_v58 = vsub.f32 %v660_v55, %v662_v56 }
 0x279   :  { %v665_v59 = vadd.f32 1e-05, %v663_v57 }
 0x27a   :  { %v666_v60 = vadd.f32 1e-05, %v664_v58 }
 0x27b   :  { %1218 = vrsqrt.f32 %v665_v59 }
 0x27c   :  { %1220 = vrsqrt.f32 %v666_v60 }
 0x285   :  { %v1219_v61 = vpop.eup %1218 }
 0x286   :  { %v1221_v62 = vpop.eup %1220  ;;  %v669_v16 = vmul.f32 %v1219_v61, %v1588_v11 }
 0x287   :  { %v670_v0 = vmul.f32 %v1221_v62, %v1590_v12 }
 0x288   :  { %v671_v33 = vmul.f32 %v669_v16, %v643_v31  ;;  %v684_v2 = vrot.slane %v669_v16, %v1680_v63 }
 0x289   :  { %v672_v1 = vmul.f32 %v670_v0, %v644_v30  ;;  %v688_v22 = vrot.slane %v670_v0, %v1680_v63 }
 0x28a   :  { %v675_v18 = vrot.slane %v671_v33, 7  ;;  %v689_v17 = vmul.f32 %v684_v2, %v625_v46 }
 0x28b   :  { %v676_v37 = vrot.slane %v672_v1, 7  ;;  %v690_v5 = vmul.f32 %v688_v22, %v627_v13 }
 0x28c   :  { %v679_v3 = vsub.f32 %v1588_v11, %v675_v18 }
 0x28d   :  { %v680_v24 = vsub.f32 %v1590_v12, %v676_v37 }
 0x28e   :  { %v694_v4 = vrot.slane %v679_v3, %v1685_v19 }
 0x28f   :  { %v698_v6 = vrot.slane %v680_v24, %v1685_v19 }
 0x290   :  { %v699_v47 = vadd.f32 %v694_v4, %v689_v17 }
 0x291   :  { %v700_v34 = vadd.f32 %v698_v6, %v690_v5 }
 0x292   :  { %v701_v35 = vmax.f32 %v699_v47, 0.0 }
 0x293   :  { %v702_v36 = vmax.f32 %v700_v34, 0.0 }
 0x294   :  { %v711_v38 = vmul.f32 %v1694_v14, %v701_v35 }
 0x295   :  { %v712_v39 = vmul.f32 %v1697_v48, %v702_v36 }
 0x297   :  { %v713_v46 = vadd.f32 %v712_v39, %v711_v38 }
 0x299   :  { %714 = vadd.xlane.f32.xlu0 %v713_v46 }
 0x2a4   :  { %v905_v40 = vpop.f32.mrb[4].mxu1 }
 0x2a5   :  { %v906_v13 = vadd.f32 %v905_v40, %v1671_v32  ;;  %v907_v41 = vpop.f32.mrb[5].mxu1 }
 0x2a6   :  { %v908_v7 = vadd.f32 %v907_v41, %v1674_v42  ;;  %v909_v43 = vpop.f32.mrb[6].mxu1 }
 0x2a7   :  { %v912_v44 = vrot.slane %v906_v13, 4  ;;  %v926_v49 = vmul.f32 %v906_v13, %v906_v13  ;;  %v910_v45 = vpop.f32.mrb[7].mxu1 }
 0x2a8   :  { %v918_v8 = vrot.slane %v908_v7, 4  ;;  %v927_v10 = vmul.f32 %v908_v7, %v908_v7 }
 0x2a9   :  { %v913_v50 = vadd.f32 %v912_v44, %v906_v13  ;;  %v928_v15 = vrot.slane %v926_v49, 4 }
 0x2aa   :  { %v919_v20 = vadd.f32 %v918_v8, %v908_v7  ;;  %v934_v25 = vrot.slane %v927_v10, 4 }
 0x2ab   :  { %v914_v21 = vrot.slane %v913_v50, 2  ;;  %v929_v51 = vadd.f32 %v928_v15, %v926_v49 }
 0x2ac   :  { %v920_v27 = vrot.slane %v919_v20, 2  ;;  %v935_v28 = vadd.f32 %v934_v25, %v927_v10 }
 0x2ad   :  { %v915_v52 = vadd.f32 %v914_v21, %v913_v50  ;;  %v930_v26 = vrot.slane %v929_v51, 2 }
 0x2ae   :  { %v921_v32 = vadd.f32 %v920_v27, %v919_v20  ;;  %v936_v31 = vrot.slane %v935_v28, 2 }
 0x2af   :  { %v916_v29 = vrot.slane %v915_v52, 1  ;;  %v931_v42 = vadd.f32 %v930_v26, %v929_v51 }
 0x2b0   :  { %v922_v30 = vrot.slane %v921_v32, 1  ;;  %v937_v53 = vadd.f32 %v936_v31, %v935_v28 }
 0x2b1   :  { %v917_v54 = vadd.f32 %v916_v29, %v915_v52  ;;  %v932_v55 = vrot.slane %v931_v42, 1 }
 0x2b2   :  { %v923_v56 = vadd.f32 %v922_v30, %v921_v32  ;;  %v938_v57 = vrot.slane %v937_v53, 1 }
 0x2b3   :  { %v924_v58 = vmul.f32 0.125, %v917_v54  ;;  %v933_v59 = vadd.f32 %v932_v55, %v931_v42 }
 0x2b4   :  { %v925_v60 = vmul.f32 0.125, %v923_v56  ;;  %v939_v61 = vadd.f32 %v938_v57, %v937_v53 }
 0x2b5   :  { %v940_v62 = vmul.f32 0.125, %v933_v59  ;;  %v942_v16 = vmul.f32 %v924_v58, %v924_v58 }
 0x2b6   :  { %v941_v0 = vmul.f32 0.125, %v939_v61  ;;  %v943_v33 = vmul.f32 %v925_v60, %v925_v60 }
 0x2b7   :  { %v944_v1 = vsub.f32 %v940_v62, %v942_v16 }
 0x2b8   :  { %v945_v18 = vsub.f32 %v941_v0, %v943_v33 }
 0x2b9   :  { %v946_v2 = vadd.f32 1e-05, %v944_v1 }
 0x2ba   :  { %v947_v37 = vadd.f32 1e-05, %v945_v18 }
 0x2bb   :  { %1222 = vrsqrt.f32 %v946_v2 }
 0x2bc   :  { %1224 = vrsqrt.f32 %v947_v37 }
 0x2c5   :  { %v1223_v22 = vpop.eup %1222 }
 0x2c6   :  { %v1225_v3 = vpop.eup %1224  ;;  %v950_v23 = vmul.f32 %v1223_v22, %v1588_v11 }
 0x2c7   :  { %v951_v24 = vmul.f32 %v1225_v3, %v1590_v12 }
 0x2c8   :  { %v952_v17 = vmul.f32 %v950_v23, %v924_v58  ;;  %v965_v4 = vrot.slane %v950_v23, %v1680_v63 }
 0x2c9   :  { %v953_v5 = vmul.f32 %v951_v24, %v925_v60  ;;  %v969_v6 = vrot.slane %v951_v24, %v1680_v63 }
 0x2ca   :  { %v956_v47 = vrot.slane %v952_v17, 7  ;;  %v970_v34 = vmul.f32 %v965_v4, %v906_v13  ;;  %v718_v13 = vsub.s32 7, %v1585_v9 }
 0x2cb   :  { %v957_v35 = vrot.slane %v953_v5, 7  ;;  %v971_v36 = vmul.f32 %v969_v6, %v908_v7 }
 0x2cc   :  { %v960_v38 = vsub.f32 %v1588_v11, %v956_v47  ;;  %v719_v7 = vrot.slane %v1588_v11, %v718_v13 }
 0x2cd   :  { %v961_v39 = vsub.f32 %v1590_v12, %v957_v35 }
 0x2ce   :  { %v975_v46 = vrot.slane %v960_v38, %v1685_v19 }
 0x2cf   :  { %v979_v40 = vrot.slane %v961_v39, %v1685_v19 }
 0x2d0   :  { %v980_v41 = vadd.f32 %v975_v46, %v970_v34 }
 0x2d1   :  { %v981_v43 = vadd.f32 %v979_v40, %v971_v36 }
 0x2d2   :  { %v982_v44 = vmax.f32 %v980_v41, 0.0 }
 0x2d3   :  { %v983_v49 = vmax.f32 %v981_v43, 0.0 }
 0x2d4   :  { %v984_v45 = vmul.f32 %v982_v44, %v1694_v14 }
 0x2d5   :  { %v985_v63 = vmul.f32 %v983_v49, %v1697_v48 }
 0x2d7   :  { %v986_v8 = vadd.f32 %v985_v63, %v984_v45 }
 0x2d9   :  { %987 = vadd.xlane.f32.xlu0 %v986_v8 }
 0x326   :  { %v715_v10 = vpop.xlane.xlu0 %714 }
 0x327   :  { %v720_v12 = vadd.f32 %v719_v7, %v715_v10 }
 0x329   :  { %v722_v50 = vand.u32 2147483647, %v720_v12  ;;  %v721_v52 = vmax.f32 %v720_v12, 0.0 }
 0x32b   :  { %v723_v15 = vsub.f32 0.0, %v722_v50 }
 0x32d   :  { %v724_v20 = vmul.f32 1.442695, %v723_v15 }
 0x32f   :  { %1226 = vpow2.f32 %v724_v20 }
 0x339   :  { %v1227_v19 = vpop.eup %1226 }
 0x33a   :  { %v726_v25 = vadd.f32 1.0, %v1227_v19  ;;  %v729_v21 = vmul.f32 -0.5, %v1227_v19  ;;  %v732_v14 = vand.u32 2147483647, %v1227_v19 }
 0x33c   :  { %1228 = vlog2.f32 %v726_v25  ;;  %v730_v51 = vadd.f32 1.0, %v729_v21  ;;  %vm733_vm0 = vcmp.lt.f32.partialorder %v732_v14, 0.0004427343 }
 0x33e   :  { %v731_v28 = vmul.f32 %v1227_v19, %v730_v51 }
 0x346   :  { %v1229_v27 = vpop.eup %1228 }
 0x347   :  { %v728_v48 = vmul.f32 0.6931472, %v1229_v27 }
 0x349   :  { %v734_v9 = vsel %vm733_vm0, %v731_v28, %v728_v48 }
 0x34a   :  { %v735_v26 = vadd.f32 %v734_v9, %v721_v52 }
 0x34c   :  { %v736_v11 = vsub.f32 %v735_v26, %v720_v12 }
 0x34e   :  { %v737_v32 = vmin.f32 %v736_v11, 100.0 }
 0x350   :  { %v739_v31 = vsel %vm738_vm1, %v737_v32, 0.0 }
 0x351   :  { %740 = vadd.xlane.f32.xlu1 %v739_v31 }
 0x366   :  { %v988_v29 = vpop.xlane.xlu0 %987 }
 0x367   :  { %v989_v42 = vadd.f32 %v988_v29, %v719_v7 }
 0x369   :  { %v991_v30 = vand.u32 2147483647, %v989_v42  ;;  %v990_v16 = vmax.f32 %v989_v42, 0.0 }
 0x36b   :  { %v992_v53 = vsub.f32 0.0, %v991_v30 }
 0x36d   :  { %v993_v54 = vmul.f32 1.442695, %v992_v53 }
 0x36f   :  { %1230 = vpow2.f32 %v993_v54 }
 0x379   :  { %v1231_v55 = vpop.eup %1230 }
 0x37a   :  { %v995_v56 = vadd.f32 1.0, %v1231_v55  ;;  %v998_v57 = vmul.f32 -0.5, %v1231_v55  ;;  %v1001_v59 = vand.u32 2147483647, %v1231_v55 }
 0x37c   :  { %1232 = vlog2.f32 %v995_v56  ;;  %v999_v58 = vadd.f32 1.0, %v998_v57  ;;  %vm1002_vm2 = vcmp.lt.f32.partialorder %v1001_v59, 0.0004427343 }
 0x37e   :  { %v1000_v62 = vmul.f32 %v1231_v55, %v999_v58 }
 0x386   :  { %v1233_v60 = vpop.eup %1232 }
 0x387   :  { %v997_v61 = vmul.f32 0.6931472, %v1233_v60 }
 0x389   :  { %v1003_v0 = vsel %vm1002_vm2, %v1000_v62, %v997_v61 }
 0x38a   :  { %v1004_v33 = vadd.f32 %v1003_v0, %v990_v16 }
 0x38c   :  { %v1005_v1 = vmin.f32 %v1004_v33, 100.0 }
 0x38e   :  { %v1006_v18 = vsel %vm738_vm1, %v1005_v1, 0.0 }
 0x38f   :  { %1007 = vadd.xlane.f32.xlu1 %v1006_v18 }
 0x3de   :  { %v741_v2 = vpop.xlane.xlu1 %740 }
 0x3df   :  { %v742_v37 = vrot.slane %v741_v2, 4 }
 0x3e1   :  { %v743_v22 = vadd.f32 %v742_v37, %v741_v2 }
 0x3e3   :  { %v744_v3 = vrot.slane %v743_v22, 2 }
 0x3e5   :  { %v745_v23 = vadd.f32 %v744_v3, %v743_v22 }
 0x3e7   :  { %v746_v24 = vrot.slane %v745_v23, 1 }
 0x3e9   :  { %v747_v17 = vadd.f32 %v746_v24, %v745_v23 }
 0x3eb   :  { %1103 = vpush %v747_v17 }
 0x41c   :  { %v1008_v4 = vpop.xlane.xlu1 %1007  ;;  %s1104_s3 = spop %1103 }
 0x41d   :  { %v1009_v5 = vrot.slane %v1008_v4, 4  ;;  %s751_s10 = smul.f32 0.125, %s1104_s3 }
 0x41f   :  { %v1010_v6 = vadd.f32 %v1009_v5, %v1008_v4 }
 0x421   :  { %v1011_v47 = vrot.slane %v1010_v6, 2 }
 0x423   :  { %v1012_v34 = vadd.f32 %v1011_v47, %v1010_v6 }
 0x425   :  { %v1013_v35 = vrot.slane %v1012_v34, 1 }
 0x427   :  { %v1014_v36 = vadd.f32 %v1013_v35, %v1012_v34 }
 0x429   :  { %1105 = vpush %v1014_v36 }
 0x45a   :  { %s1106_s1 = spop %1105 }
 0x45b   :  { %s1018_s11 = smul.f32 0.125, %s1106_s1 }
 0x45d   :  { %s1019_s12 = sadd.f32 %s1018_s11, %s751_s10 }
 0x45f   :  { %s1020_s13 = smul.f32 0.5, %s1019_s12 }
 0x461   :  { %1022 = sst [smem:[#allocation10]] %s1020_s13 }
 0x462   :  { %1331 = shalt.err (!%p1328_p6)
}
 0x463   :  { %s1346_s22 = smov [#allocation10]  }
 0x464   :  { %1030 = dma.smem_to_hbm %s1346_s22, 16, %s1733_s4, [#allocation4]  }
 0x465   :  { %1338 = dma.done.wait [#allocation4], 16  }
 0x466   :  { %1339 = vsyncadd [#allocation4], 4294967280 }
 0x467   :  { %1034 = sfence }
 0x468   :  { %1035 = vsyncpa [#allocation3], 1 }
 0x469   :  { %1036 = vsyncpa [#allocation6], 1 }
 0x46a   :  { %1037 = vsyncpa [#allocation9], 1 }
 0x46b   :  { %1038 = vsyncpa [#allocation4], 1 }

</bundles_post_ra>
